<compile_context>
chip_gen: v7x
topology: tpu7x:2x2x1
jax: 0.10.0
libtpu: 0.0.40
codegen_flags: <defaults>
</compile_context>

<pallas_src>
import functools

import jax
import jax.numpy as jnp
from jax.experimental import pallas as pl
from jax.experimental.pallas import tpu as pltpu

_LANE = 128


def _round_up(x, m):
    return ((x + m - 1) // m) * m


def _cdiv(a, b):
    return -(-a // b)


def _pad_axis(x, axis, target):
    pad = target - x.shape[axis]
    if pad == 0:
        return x
    widths = [(0, 0)] * x.ndim
    widths[axis] = (0, pad)
    return jnp.pad(x, widths)


def _tpu_budget():
    """Per-generation VMEM budget (bytes) and TensorCore count."""
    try:
        cap = pltpu.get_tpu_info().vmem_capacity_bytes
    except Exception:
        cap = 128 * 1024 * 1024
    if cap <= 64 * 1024 * 1024:            # v7x: 64 MiB per TC, 2 TCs / chip
        return 36 * 1024 * 1024, 2
    return 96 * 1024 * 1024, 1             # v5e / v6e: 128 MiB, 1 TC


# -----------------------------------------------------------------------------
# Pass 1a: full-K GEMM (weight tile resident across M tiles) + per-tile
#          per-channel sum / sum-of-squares for BatchNorm. bf16 writeback.
# -----------------------------------------------------------------------------
def _gemm_stats_resident_kernel(a_ref, w_ref, o_ref, stats_ref):
    y = jnp.dot(a_ref[...], w_ref[...], preferred_element_type=jnp.float32)
    stats_ref[0:1, :] = jnp.sum(y, axis=0, keepdims=True)
    stats_ref[1:2, :] = jnp.sum(y * y, axis=0, keepdims=True)
    o_ref[...] = y.astype(o_ref.dtype)


# -----------------------------------------------------------------------------
# Pass 1b: K-tiled GEMM with an f32 VMEM accumulator; stats + bf16 writeback
#          on the last k step.  NOTE: the output/stats blocks must stay
#          resident across the (innermost, "arbitrary") k axis -- do not
#          reorder the grid or change dimension_semantics for that axis.
# -----------------------------------------------------------------------------
def _gemm_stats_ktiled_kernel(a_ref, w_ref, o_ref, stats_ref, acc_ref):
    k = pl.program_id(2)

    @pl.when(k == 0)
    def _init():
        acc_ref[...] = jnp.zeros_like(acc_ref)

    acc_ref[...] += jnp.dot(a_ref[...], w_ref[...],
                            preferred_element_type=jnp.float32)

    @pl.when(k == pl.num_programs(2) - 1)
    def _finalize():
        y = acc_ref[...]
        stats_ref[0:1, :] = jnp.sum(y, axis=0, keepdims=True)
        stats_ref[1:2, :] = jnp.sum(y * y, axis=0, keepdims=True)
        o_ref[...] = y.astype(o_ref.dtype)


# -----------------------------------------------------------------------------
# Pass 2: M-tiled per-channel scale/shift + activation (mem-bound epilogue).
#         Reads the bf16 conv intermediate, writes the f32 result.
# -----------------------------------------------------------------------------
def _bn_act_kernel(y_ref, ss_ref, o_ref, *, neg_slope):
    y = y_ref[...].astype(jnp.float32)               # [tm, Cpad]
    out = y * ss_ref[0:1, :] + ss_ref[1:2, :]        # fused scale/shift
    if neg_slope == 0.0:
        o_ref[...] = jnp.maximum(out, 0.0)
    else:
        o_ref[...] = jnp.where(out > 0, out, neg_slope * out)


def _conv_bn_act(patches, w_mat, gamma, beta, *, eps, neg_slope):
    """patches: [P, M, K] (bf16), w_mat: [P, K, Cout] f32.
    Returns BN+activation(conv) as [P, M, Cout] f32.
    P = number of polyphase GEMMs (1 for Conv2d, 4 for ConvTranspose2d)."""
    P, M, K = patches.shape
    Cout = w_mat.shape[2]
    Cpad = _round_up(Cout, _LANE)                    # lane-dense output channels

    budget, num_cores = _tpu_budget()
    fit_budget = (budget * 3) // 4                   # headroom for compiler scratch

    # ---- M tiling: small padding, even >=2 split when one parallel axis -----
    tm_cap = 512 if budget <= 40 * 1024 * 1024 else 1024
    min_tiles = 2 if (num_cores > 1 and P == 1) else 1
    n_tiles = max(_cdiv(M, tm_cap), min_tiles)
    if num_cores > 1 and P == 1 and n_tiles % 2:
        n_tiles += 1                                 # even split across 2 TCs
    tm = max(_round_up(_cdiv(M, n_tiles), 8), 8)
    Mp = _round_up(M, tm)
    Mt = Mp // tm

    # ---- K tiling: keep full-K weight resident if the tiles fit VMEM --------
    def fits(tk_):
        kdim = K if tk_ >= K else tk_
        a_b = 2 * tm * kdim * 2                      # bf16, double-buffered
        w_b = 2 * kdim * Cpad * 2
        o_b = 2 * tm * Cpad * 2                      # bf16 writeback
        acc = 0 if tk_ >= K else tm * Cpad * 4       # f32 accumulator scratch
        st = 2 * 2 * Cpad * 4
        return a_b + w_b + o_b + acc + st <= fit_budget

    if fits(K):
        resident, tk, Kp = True, K, K
    else:
        resident, tk = False, 512
        for cand in (2048, 1024):
            if cand < K and fits(cand):
                tk = cand
                break
        while not fits(tk) and tm > 8:               # safety: shrink M tile
            tm = max(_round_up(tm // 2, 8), 8)
            Mp = _round_up(M, tm)
            Mt = Mp // tm
        Kp = _round_up(K, tk)
    Kt = Kp // tk

    a = _pad_axis(_pad_axis(patches.astype(jnp.bfloat16), 1, Mp), 2, Kp)
    w = _pad_axis(_pad_axis(w_mat.astype(jnp.bfloat16), 1, Kp), 2, Cpad)

    out_shapes = (jax.ShapeDtypeStruct((P, Mp, Cpad), jnp.bfloat16),
                  jax.ShapeDtypeStruct((P, Mt, 2, Cpad), jnp.float32))

    if resident:
        conv, stats = pl.pallas_call(
            _gemm_stats_resident_kernel,
            out_shape=out_shapes,
            grid_spec=pltpu.PrefetchScalarGridSpec(
                num_scalar_prefetch=0,
                grid=(P, Mt),
                in_specs=[
                    pl.BlockSpec((None, tm, Kp), lambda p, i: (p, i, 0)),
                    # index ignores i -> weight block stays resident (one DMA per phase)
                    pl.BlockSpec((None, Kp, Cpad), lambda p, i: (p, 0, 0)),
                ],
                out_specs=(
                    pl.BlockSpec((None, tm, Cpad), lambda p, i: (p, i, 0)),
                    pl.BlockSpec((None, None, 2, Cpad),
                                 lambda p, i: (p, i, 0, 0)),
                ),
            ),
            compiler_params=pltpu.CompilerParams(
                dimension_semantics=("parallel", "parallel"),
                vmem_limit_bytes=budget),
        )(a, w)
    else:
        conv, stats = pl.pallas_call(
            _gemm_stats_ktiled_kernel,
            out_shape=out_shapes,
            grid_spec=pltpu.PrefetchScalarGridSpec(
                num_scalar_prefetch=0,
                grid=(P, Mt, Kt),
                in_specs=[
                    pl.BlockSpec((None, tm, tk), lambda p, i, k: (p, i, k)),
                    pl.BlockSpec((None, tk, Cpad), lambda p, i, k: (p, k, 0)),
                ],
                out_specs=(
                    pl.BlockSpec((None, tm, Cpad), lambda p, i, k: (p, i, 0)),
                    pl.BlockSpec((None, None, 2, Cpad),
                                 lambda p, i, k: (p, i, 0, 0)),
                ),
                scratch_shapes=[pltpu.VMEM((tm, Cpad), jnp.float32)],
            ),
            compiler_params=pltpu.CompilerParams(
                dimension_semantics=("parallel", "parallel", "arbitrary"),
                vmem_limit_bytes=budget),
        )(a, w)

    # Tiny XLA reduction of per-(phase, M-tile) stats to per-channel
    # scale/shift.  Zero-padded M rows / K cols / Cout cols contribute exactly
    # zero, so dividing by the true element count P*M gives PyTorch's biased
    # (training-mode) batch statistics.
    s = jnp.sum(stats, axis=(0, 1))                  # [2, Cpad]
    inv_m = 1.0 / float(P * M)
    mean = s[0] * inv_m
    var = jnp.maximum(s[1] * inv_m - mean * mean, 0.0)
    gpad = _pad_axis(gamma.astype(jnp.float32), 0, Cpad)
    bpad = _pad_axis(beta.astype(jnp.float32), 0, Cpad)
    scale = gpad * jax.lax.rsqrt(var + eps)
    shift = bpad - mean * scale
    ss = jnp.stack([scale, shift], axis=0)           # [2, Cpad]

    R = P * Mp
    conv2d = conv.reshape(R, Cpad)                   # bf16 intermediate
    kernel = functools.partial(_bn_act_kernel, neg_slope=neg_slope)
    out = pl.pallas_call(
        kernel,
        out_shape=jax.ShapeDtypeStruct((R, Cpad), jnp.float32),
        grid_spec=pltpu.PrefetchScalarGridSpec(
            num_scalar_prefetch=0,
            grid=(R // tm,),
            in_specs=[pl.BlockSpec((tm, Cpad), lambda i: (i, 0)),
                      pl.BlockSpec((2, Cpad), lambda i: (0, 0))],
            out_specs=pl.BlockSpec((tm, Cpad), lambda i: (i, 0)),
        ),
        compiler_params=pltpu.CompilerParams(
            dimension_semantics=("parallel",),
            vmem_limit_bytes=budget),
    )(conv2d, ss)

    return out.reshape(P, Mp, Cpad)[:, :M, :Cout]


# -----------------------------------------------------------------------------
# Patch extraction (XLA glue; input already bf16, no zero-dilated inputs)
# -----------------------------------------------------------------------------
def _patches_down(x_nhwc):
    """Conv2d(k=4, s=2, p=1) im2col.  [N,H,W,C] -> [1, N*Ho*Wo, 16*C]."""
    N, H, W, C = x_nhwc.shape
    Ho, Wo = H // 2, W // 2
    xp = jnp.pad(x_nhwc, ((0, 0), (1, 1), (1, 1), (0, 0)))
    cols = [xp[:, kh:kh + 2 * Ho:2, kw:kw + 2 * Wo:2, :]
            for kh in range(4) for kw in range(4)]
    patches = jnp.concatenate(cols, axis=-1)         # [N,Ho,Wo,16*C]
    return patches.reshape(1, N * Ho * Wo, 16 * C), (N, Ho, Wo)


# ConvTranspose2d(k=4, s=2, p=1) polyphase: output parity 0 uses kernel taps
# (3, 1), parity 1 uses taps (2, 0) (per spatial dim), each hitting a 2x2
# window of real input samples (no 75%-zero dilated input).
_UP_TAPS = ((3, 1), (2, 0))


def _patches_up(x_nhwc):
    """Polyphase patches: [N,H,W,C] -> [4, N*H*W, 4*C]  (phase p = ph*2+pw)."""
    N, H, W, C = x_nhwc.shape
    xp = jnp.pad(x_nhwc, ((0, 0), (1, 1), (1, 1), (0, 0)))
    phases = []
    for ph in range(2):
        for pw in range(2):
            cols = [xp[:, ph + r:ph + r + H, pw + c:pw + c + W, :]
                    for r in range(2) for c in range(2)]
            phases.append(
                jnp.concatenate(cols, axis=-1).reshape(N * H * W, 4 * C))
    return jnp.stack(phases, axis=0), (N, H, W)


def _w_mat_up(weight):
    """ConvTranspose2d weight [Cin, Cout, 4, 4] -> per-phase GEMM matrices
    [4, 4*Cin, Cout] matching the K ordering of _patches_up."""
    cin, cout = weight.shape[0], weight.shape[1]
    mats = []
    for ph in range(2):
        for pw in range(2):
            taps = [weight[:, :, _UP_TAPS[ph][r], _UP_TAPS[pw][c]]
                    for r in range(2) for c in range(2)]      # each [Cin, Cout]
            mats.append(jnp.stack(taps, axis=0).reshape(4 * cin, cout))
    return jnp.stack(mats, axis=0)


# -----------------------------------------------------------------------------
# Forward / module port
# -----------------------------------------------------------------------------
def _block_forward(x_nchw, weight, gamma, beta, *, downsample, eps, neg_slope):
    # bf16 BEFORE the layout transpose / im2col -> all patch glue runs in bf16.
    x = jnp.transpose(x_nchw.astype(jnp.bfloat16), (0, 2, 3, 1))  # NCHW -> NHWC
    cin = x.shape[-1]
    if downsample:
        patches, (N, Ho, Wo) = _patches_down(x)
        cout = weight.shape[0]
        # Conv2d weight [Cout, Cin, kh, kw] -> [1, 16*Cin, Cout]
        w_mat = jnp.transpose(weight, (2, 3, 1, 0)).reshape(1, 16 * cin, cout)
        out = _conv_bn_act(patches, w_mat, gamma, beta,
                           eps=eps, neg_slope=neg_slope)          # [1, M, Cout]
        out = out.reshape(N, Ho, Wo, cout)
        return jnp.transpose(out, (0, 3, 1, 2))                   # NHWC -> NCHW
    else:
        patches, (N, H, W) = _patches_up(x)
        cout = weight.shape[1]
        w_mat = _w_mat_up(weight)                                 # [4, 4*Cin, Cout]
        out = _conv_bn_act(patches, w_mat, gamma, beta,
                           eps=eps, neg_slope=neg_slope)          # [4, M, Cout]
        # Single fused re-assembly: (ph, pw, N, H, W, C) -> (N, C, 2H, 2W).
        out = out.reshape(2, 2, N, H, W, cout)
        out = jnp.transpose(out, (2, 5, 3, 0, 4, 1))
        return out.reshape(N, cout, 2 * H, 2 * W)


class BlockPallas:
    """Pallas TPU port of the PyTorch UNet `Block`."""

    def __init__(self, in_channels, out_channels, downsample=True,
                 activation='relu', key=None):
        if key is None:
            key = jax.random.PRNGKey(0)
        self.in_channels = in_channels
        self.out_channels = out_channels
        self.downsample = downsample
        self.neg_slope = 0.0 if activation == 'relu' else 0.2
        self.eps = 1e-5
        k = 4
        bound = 1.0 / float((in_channels * k * k) ** 0.5)
        if downsample:
            w_shape = (out_channels, in_channels, k, k)           # Conv2d
        else:
            w_shape = (in_channels, out_channels, k, k)           # ConvTranspose2d
        self.weight = jax.random.uniform(key, w_shape, jnp.float32, -bound, bound)
        self.gamma = jnp.ones((out_channels,), jnp.float32)       # BN default init
        self.beta = jnp.zeros((out_channels,), jnp.float32)
        self._fwd = jax.jit(functools.partial(
            _block_forward, downsample=downsample, eps=self.eps,
            neg_slope=self.neg_slope))

    def __call__(self, x_nchw):
        return self._fwd(x_nchw, self.weight, self.gamma, self.beta)


# -----------------------------------------------------------------------------
# Pure-JAX reference (for correctness / bf16 tolerance check)
# -----------------------------------------------------------------------------
def _reference_block(x, weight, gamma, beta, downsample, neg_slope, eps=1e-5):
    if downsample:
        y = jax.lax.conv_general_dilated(
            x, weight, window_strides=(2, 2), padding=((1, 1), (1, 1)),
            dimension_numbers=('NCHW', 'OIHW', 'NCHW'))
    else:
        w = jnp.transpose(weight, (1, 0, 2, 3))[:, :, ::-1, ::-1]
        y = jax.lax.conv_general_dilated(
            x, w, window_strides=(1, 1), padding=((2, 2), (2, 2)),
            lhs_dilation=(2, 2), dimension_numbers=('NCHW', 'OIHW', 'NCHW'))
    mean = jnp.mean(y, axis=(0, 2, 3), keepdims=True)
    var = jnp.mean((y - mean) ** 2, axis=(0, 2, 3), keepdims=True)
    out = (y - mean) * jax.lax.rsqrt(var + eps)
    out = out * gamma.reshape(1, -1, 1, 1) + beta.reshape(1, -1, 1, 1)
    return jnp.where(out > 0, out, neg_slope * out)


if __name__ == "__main__":
    key = jax.random.PRNGKey(0)
    kx, kw_down, kw_up = jax.random.split(key, 3)

    # Downsample block: Conv2d(4->8, k4 s2 p1, no bias) + BN + ReLU
    x = jax.random.normal(kx, (2, 4, 16, 16), jnp.float32)        # NCHW
    down = BlockPallas(4, 8, downsample=True, activation='relu', key=kw_down)
    y_down = jax.block_until_ready(down(x))
    assert y_down.shape == (2, 8, 8, 8), y_down.shape
    ref_down = _reference_block(x, down.weight, down.gamma, down.beta,
                                True, down.neg_slope)
    assert float(jnp.max(jnp.abs(y_down - ref_down))) < 5e-2

    # Upsample block: ConvTranspose2d(8->4, k4 s2 p1, no bias) + BN + LeakyReLU
    up = BlockPallas(8, 4, downsample=False, activation='leaky', key=kw_up)
    y_up = jax.block_until_ready(up(y_down))
    assert y_up.shape == (2, 4, 16, 16), y_up.shape
    ref_up = _reference_block(y_down, up.weight, up.gamma, up.beta,
                              False, up.neg_slope)
    assert float(jnp.max(jnp.abs(y_up - ref_up))) < 5e-2

    print("KERNEL_OK")
</pallas_src>

<mosaic_0001>
module attributes {stable_mosaic.version = 11 : i64} {
  func.func @_gemm_stats_resident_kernel(%arg0: i32, %arg1: i32, %arg2: memref<1x128x64xbf16, #tpu.memory_space<vmem>>, %arg3: memref<1x64x128xbf16, #tpu.memory_space<vmem>>, %arg4: memref<1x128x128xbf16, #tpu.memory_space<vmem>>, %arg5: memref<1x1x2x128xf32, #tpu.memory_space<vmem>>) attributes {dimension_semantics = [#tpu.dimension_semantics<parallel>, #tpu.dimension_semantics<parallel>], iteration_bounds = array<i64: 1, 1>, scalar_prefetch = 0 : i64, scratch_operands = 0 : i64, tpu.core_type = #tpu.core_type<tc>, window_params = [{transform_indices = @transform_0, window_bounds = array<i64: 1, 128, 64>}, {transform_indices = @transform_1, window_bounds = array<i64: 1, 64, 128>}, {transform_indices = @transform_2, window_bounds = array<i64: 1, 128, 128>}, {transform_indices = @transform_3, window_bounds = array<i64: 1, 1, 2, 128>}]} {
    %c0 = arith.constant 0 : index
    %c0_0 = arith.constant 0 : index
    %c0_1 = arith.constant 0 : index
    %0 = vector.load %arg2[%c0, %c0_0, %c0_1] : memref<1x128x64xbf16, #tpu.memory_space<vmem>>, vector<1x128x64xbf16>
    %1 = vector.shape_cast %0 : vector<1x128x64xbf16> to vector<128x64xbf16>
    %c0_2 = arith.constant 0 : index
    %c0_3 = arith.constant 0 : index
    %c0_4 = arith.constant 0 : index
    %2 = vector.load %arg3[%c0_2, %c0_3, %c0_4] : memref<1x64x128xbf16, #tpu.memory_space<vmem>>, vector<1x64x128xbf16>
    %3 = vector.shape_cast %2 : vector<1x64x128xbf16> to vector<64x128xbf16>
    %cst = arith.constant dense<0.000000e+00> : vector<128x128xf32>
    %4 = tpu.matmul %1, %3, %cst {dimension_numbers = #tpu.dot_dimension_numbers<[1], [0], [0], [1], [0, 0, 1, 1], [], []>} : vector<128x64xbf16>, vector<64x128xbf16>, vector<128x128xf32> -> vector<128x128xf32>
    %cst_5 = arith.constant dense<0.000000e+00> : vector<128xf32>
    %5 = vector.multi_reduction <add>, %4, %cst_5 [0] : vector<128x128xf32> to vector<128xf32>
    %6 = vector.shape_cast %5 : vector<128xf32> to vector<1x128xf32>
    %c0_6 = arith.constant 0 : index
    %c0_7 = arith.constant 0 : index
    %c0_8 = arith.constant 0 : index
    %c0_9 = arith.constant 0 : index
    %7 = vector.load %arg5[%c0_6, %c0_7, %c0_8, %c0_9] : memref<1x1x2x128xf32, #tpu.memory_space<vmem>>, vector<1x1x1x128xf32>
    %8 = vector.shape_cast %7 : vector<1x1x1x128xf32> to vector<1x128xf32>
    %9 = vector.shape_cast %6 : vector<1x128xf32> to vector<1x1x1x128xf32>
    tpu.vector_store %arg5[%c0_6, %c0_7, %c0_8, %c0_9], %9 {strides = array<i32>} : memref<1x1x2x128xf32, #tpu.memory_space<vmem>>, vector<1x1x1x128xf32>,
    %10 = arith.mulf %4, %4 : vector<128x128xf32>
    %cst_10 = arith.constant dense<0.000000e+00> : vector<128xf32>
    %11 = vector.multi_reduction <add>, %10, %cst_10 [0] : vector<128x128xf32> to vector<128xf32>
    %12 = vector.shape_cast %11 : vector<128xf32> to vector<1x128xf32>
    %c0_11 = arith.constant 0 : index
    %c0_12 = arith.constant 0 : index
    %c1 = arith.constant 1 : index
    %c0_13 = arith.constant 0 : index
    %13 = vector.load %arg5[%c0_11, %c0_12, %c1, %c0_13] : memref<1x1x2x128xf32, #tpu.memory_space<vmem>>, vector<1x1x1x128xf32>
    %14 = vector.shape_cast %13 : vector<1x1x1x128xf32> to vector<1x128xf32>
    %15 = vector.shape_cast %12 : vector<1x128xf32> to vector<1x1x1x128xf32>
    tpu.vector_store %arg5[%c0_11, %c0_12, %c1, %c0_13], %15 {strides = array<i32>} : memref<1x1x2x128xf32, #tpu.memory_space<vmem>>, vector<1x1x1x128xf32>,
    %16 = arith.truncf %4 : vector<128x128xf32> to vector<128x128xbf16>
    %c0_14 = arith.constant 0 : index
    %c0_15 = arith.constant 0 : index
    %c0_16 = arith.constant 0 : index
    %17 = vector.load %arg4[%c0_14, %c0_15, %c0_16] : memref<1x128x128xbf16, #tpu.memory_space<vmem>>, vector<1x128x128xbf16>
    %18 = vector.shape_cast %17 : vector<1x128x128xbf16> to vector<128x128xbf16>
    %19 = vector.shape_cast %16 : vector<128x128xbf16> to vector<1x128x128xbf16>
    tpu.vector_store %arg4[%c0_14, %c0_15, %c0_16], %19 {strides = array<i32>} : memref<1x128x128xbf16, #tpu.memory_space<vmem>>, vector<1x128x128xbf16>,
    return
  }
  func.func @transform_0(%arg0: i32, %arg1: i32) -> (i32, i32, i32) {
    %c0_i32 = arith.constant 0 : i32
    %c0_i32_0 = arith.constant 0 : i32
    return %arg0, %arg1, %c0_i32 : i32, i32, i32
  }
  func.func @transform_1(%arg0: i32, %arg1: i32) -> (i32, i32, i32) {
    %c0_i32 = arith.constant 0 : i32
    %c0_i32_0 = arith.constant 0 : i32
    %c0_i32_1 = arith.constant 0 : i32
    return %arg0, %c0_i32, %c0_i32_0 : i32, i32, i32
  }
  func.func @transform_2(%arg0: i32, %arg1: i32) -> (i32, i32, i32) {
    %c0_i32 = arith.constant 0 : i32
    %c0_i32_0 = arith.constant 0 : i32
    return %arg0, %arg1, %c0_i32 : i32, i32, i32
  }
  func.func @transform_3(%arg0: i32, %arg1: i32) -> (i32, i32, i32, i32) {
    %c0_i32 = arith.constant 0 : i32
    %c0_i32_0 = arith.constant 0 : i32
    %c0_i32_1 = arith.constant 0 : i32
    return %arg0, %arg1, %c0_i32, %c0_i32_0 : i32, i32, i32, i32
  }
}

module attributes {stable_mosaic.version = 11 : i64} {
  func.func @_bn_act_kernel(%arg0: i32, %arg1: memref<128x128xbf16, #tpu.memory_space<vmem>>, %arg2: memref<2x128xf32, #tpu.memory_space<vmem>>, %arg3: memref<128x128xf32, #tpu.memory_space<vmem>>) attributes {dimension_semantics = [#tpu.dimension_semantics<parallel>], iteration_bounds = array<i64: 1>, scalar_prefetch = 0 : i64, scratch_operands = 0 : i64, tpu.core_type = #tpu.core_type<tc>, window_params = [{transform_indices = @transform_0, window_bounds = array<i64: 128, 128>}, {pipeline_mode = #tpu.pipeline_mode<synchronous>, transform_indices = @transform_1, window_bounds = array<i64: 2, 128>}, {transform_indices = @transform_2, window_bounds = array<i64: 128, 128>}]} {
    %c0 = arith.constant 0 : index
    %c0_0 = arith.constant 0 : index
    %0 = vector.load %arg1[%c0, %c0_0] : memref<128x128xbf16, #tpu.memory_space<vmem>>, vector<128x128xbf16>
    %1 = arith.extf %0 : vector<128x128xbf16> to vector<128x128xf32>
    %c0_1 = arith.constant 0 : index
    %c0_2 = arith.constant 0 : index
    %2 = vector.load %arg2[%c0_1, %c0_2] : memref<2x128xf32, #tpu.memory_space<vmem>>, vector<1x128xf32>
    %3 = vector.broadcast %2 : vector<1x128xf32> to vector<128x128xf32>
    %4 = arith.mulf %1, %3 : vector<128x128xf32>
    %c1 = arith.constant 1 : index
    %c0_3 = arith.constant 0 : index
    %5 = vector.load %arg2[%c1, %c0_3] : memref<2x128xf32, #tpu.memory_space<vmem>>, vector<1x128xf32>
    %6 = vector.broadcast %5 : vector<1x128xf32> to vector<128x128xf32>
    %7 = arith.addf %4, %6 : vector<128x128xf32>
    %cst = arith.constant 0.000000e+00 : f32
    %8 = vector.broadcast %cst : f32 to vector<128x128xf32>
    %9 = arith.maximumf %7, %8 : vector<128x128xf32>
    %c0_4 = arith.constant 0 : index
    %c0_5 = arith.constant 0 : index
    %10 = vector.load %arg3[%c0_4, %c0_5] : memref<128x128xf32, #tpu.memory_space<vmem>>, vector<128x128xf32>
    tpu.vector_store %arg3[%c0_4, %c0_5], %9 {strides = array<i32>} : memref<128x128xf32, #tpu.memory_space<vmem>>, vector<128x128xf32>,
    return
  }
  func.func @transform_0(%arg0: i32) -> (i32, i32) {
    %c0_i32 = arith.constant 0 : i32
    %c0_i32_0 = arith.constant 0 : i32
    return %arg0, %c0_i32 : i32, i32
  }
  func.func @transform_1(%arg0: i32) -> (i32, i32) {
    %c0_i32 = arith.constant 0 : i32
    %c0_i32_0 = arith.constant 0 : i32
    %c0_i32_1 = arith.constant 0 : i32
    return %c0_i32, %c0_i32_0 : i32, i32
  }
  func.func @transform_2(%arg0: i32) -> (i32, i32) {
    %c0_i32 = arith.constant 0 : i32
    %c0_i32_0 = arith.constant 0 : i32
    return %arg0, %c0_i32 : i32, i32
  }
}

</mosaic_0001>

<bundles_post_ra>
// kernel: _block_forward.3
= control target key start
LH: loop header
LB: loop body
LE: loop exit
PB: predicated region body
PF: predicated region fallthrough
CT: control target
= control target key end

     0   :  { %7 = vsyncpa [#allocation3], 0  ;;  %s376_s0 = inlined_call_operand.hbm [shape: bf16[128,128], index: 0, kind: input, shape index: {}]   ;;  %s377_s1 = inlined_call_operand.hbm [shape: f32[2,128], index: 1, kind: input, shape index: {}]   ;;  %s378_s2 = inlined_call_operand.hbm [shape: f32[128,128], index: 2, kind: output, shape index: {}]  }
   0x1   :  { %8 = vsyncpa [#allocation6], 0 }
   0x2   :  { %9 = vsyncpa [#allocation4], 0  ;;  %s282_s9 = smov [#allocation2]   ;;  %s210_s13 = scalar_lea.hbm %s376_s0, 1024 }
   0x3   :  { %s15_s10 = sshll.u32 %s282_s9, 4  ;;  %p211_p0 = scmp.ne.s32.totalorder %s376_s0, %s210_s13  ;;  %s16_s10 = int_to_ptr.vmem [resolvable:$true] %s15_s10 }
   0x4   :  { %p214_p1 = scmp.lt.u32.totalorder %s210_s13, %s376_s0 }
   0x6   :  { %p216_p2 = pnand %p214_p1, %p211_p0 }
   0x8   :  { %219 = shalt.err (!%p216_p2)
}
   0x9   :  { %s220_s18 = scalar_lea.vmem %s16_s10, 1024  ;;  %p225_p4 = scmp.lt.s32.totalorder %s16_s10, %s16_s10 }
   0xa   :  { %p221_p3 = scmp.ne.s32.totalorder %s16_s10, %s220_s18  ;;  %p226_p5 = scmp.lt.s32.totalorder %s220_s18, %s220_s18 }
   0xc   :  { %p227_p6 = por %p226_p5, %p225_p4 }
   0xe   :  { %p228_p7 = pnand %p227_p6, %p221_p3 }
  0x10   :  { %231 = shalt.err (!%p228_p7)
}
  0x11   :  { %s283_s19 = smov 64   ;;  %s284_s20 = smov 4  }
  0x12   :  { %21 = dma.hbm_to_vmem [thread:$0]  %s376_s0, 1024, %s16_s10, [#allocation3], %s283_s19, %s283_s19, %s284_s20  }
  0x13   :  { %s285_s23 = smov [#allocation5]   ;;  %s232_s27 = scalar_lea.hbm %s377_s1, 32 }
  0x14   :  { %s28_s24 = sshll.u32 %s285_s23, 4  ;;  %p233_p8 = scmp.ne.s32.totalorder %s377_s1, %s232_s27  ;;  %s29_s24 = int_to_ptr.vmem [resolvable:$true] %s28_s24 }
  0x15   :  { %p236_p9 = scmp.lt.u32.totalorder %s232_s27, %s377_s1 }
  0x17   :  { %p238_p10 = pnand %p236_p9, %p233_p8 }
  0x19   :  { %241 = shalt.err (!%p238_p10)
}
  0x1a   :  { %s242_s4 = scalar_lea.vmem %s29_s24, 32  ;;  %p247_p12 = scmp.lt.s32.totalorder %s29_s24, %s29_s24 }
  0x1b   :  { %p243_p11 = scmp.ne.s32.totalorder %s29_s24, %s242_s4  ;;  %p248_p13 = scmp.lt.s32.totalorder %s242_s4, %s242_s4 }
  0x1d   :  { %p249_p0 = por %p248_p13, %p247_p12 }
  0x1f   :  { %p250_p1 = pnand %p249_p0, %p243_p11 }
  0x21   :  { %253 = shalt.err (!%p250_p1)
}
  0x22   :  { %31 = dma.hbm_to_vmem [thread:$0]  %s377_s1, 32, %s29_s24, [#allocation6]  }
  0x23   :  { %276 = dma.done.wait [#allocation3], 1024  }
  0x24   :  { %277 = vsyncadd [#allocation3], 4294966272 }
  0x25   :  { %278 = dma.done.wait [#allocation6], 32  }
  0x26   :  { %279 = vsyncadd [#allocation6], 4294967264  ;;  %v165_v0 = vld [vmem:[#allocation2] sm:$0xff]   ;;  %v196_v4 = vld [vmem:[#allocation2 + $0x8] sm:$0xff]   ;;  %s286_s1 = smov [#allocation7]  }
  0x27   :  { %v328_v1 = vld [vmem:[#allocation5] ss:$0 sm:$0xff]  ;;  %v166_v2 = vunpack.c.l.bf16 %v165_v0  ;;  %v167_v3 = vunpack.c.h.bf16 %v165_v0  ;;  %v197_v5 = vld [vmem:[#allocation2 + $0x10] sm:$0xff]   ;;  %v198_v6 = vld [vmem:[#allocation2 + $0x18] sm:$0xff]   ;;  %v170_v8 = vunpack.c.l.bf16 %v196_v4  ;;  %v171_v9 = vunpack.c.h.bf16 %v196_v4  ;;  %s149_s6 = sshll.u32 %s286_s1, 4  ;;  %s150_s6 = int_to_ptr.vmem [resolvable:$true] %s149_s6 }
  0x28   :  { %v330_v7 = vld [vmem:[#allocation5 + $0x1] ss:$0 sm:$0xff]  ;;  %v174_v10 = vunpack.c.l.bf16 %v197_v5  ;;  %v175_v11 = vunpack.c.h.bf16 %v197_v5  ;;  %v178_v14 = vunpack.c.l.bf16 %v198_v6  ;;  %v179_v15 = vunpack.c.h.bf16 %v198_v6  ;;  %v200_v33 = vld [vmem:[#allocation2 + $0x28] sm:$0xff]   ;;  %v201_v34 = vld [vmem:[#allocation2 + $0x30] sm:$0xff]   ;;  %s254_s7 = scalar_lea.vmem %s150_s6, 2048  ;;  %p259_p3 = scmp.lt.s32.totalorder %s150_s6, %s150_s6 }
  0x29   :  { %v75_v12 = vmul.f32 %v166_v2, %v328_v1  ;;  %v76_v13 = vmul.f32 %v167_v3, %v328_v1  ;;  %v77_v16 = vmul.f32 %v170_v8, %v328_v1  ;;  %v78_v17 = vmul.f32 %v171_v9, %v328_v1  ;;  %v199_v28 = vld [vmem:[#allocation2 + $0x20] sm:$0xff]   ;;  %v202_v39 = vld [vmem:[#allocation2 + $0x38] sm:$0xff]   ;;  %p255_p2 = scmp.ne.s32.totalorder %s150_s6, %s254_s7  ;;  %p260_p4 = scmp.lt.s32.totalorder %s254_s7, %s254_s7 }
  0x2a   :  { %v79_v18 = vmul.f32 %v174_v10, %v328_v1  ;;  %v80_v19 = vmul.f32 %v175_v11, %v328_v1  ;;  %v81_v22 = vmul.f32 %v178_v14, %v328_v1  ;;  %v82_v23 = vmul.f32 %v179_v15, %v328_v1 }
  0x2b   :  { %v96_v20 = vadd.f32 %v330_v7, %v75_v12  ;;  %v97_v21 = vadd.f32 %v330_v7, %v76_v13  ;;  %v98_v24 = vadd.f32 %v330_v7, %v77_v16  ;;  %v99_v25 = vadd.f32 %v330_v7, %v78_v17  ;;  %p261_p5 = por %p260_p4, %p259_p3 }
  0x2c   :  { %v100_v26 = vadd.f32 %v330_v7, %v79_v18  ;;  %v101_v27 = vadd.f32 %v330_v7, %v80_v19  ;;  %v102_v31 = vadd.f32 %v330_v7, %v81_v22  ;;  %v103_v32 = vadd.f32 %v330_v7, %v82_v23 }
  0x2d   :  { %v112_v29 = vmax.f32 %v96_v20, 0.0  ;;  %v113_v30 = vmax.f32 %v97_v21, 0.0  ;;  %v114_v35 = vmax.f32 %v98_v24, 0.0  ;;  %v115_v36 = vmax.f32 %v99_v25, 0.0  ;;  %p262_p6 = pnand %p261_p5, %p255_p2 }
  0x2e   :  { %v116_v37 = vmax.f32 %v100_v26, 0.0  ;;  %v117_v38 = vmax.f32 %v101_v27, 0.0  ;;  %v118_v40 = vmax.f32 %v102_v31, 0.0  ;;  %v119_v41 = vmax.f32 %v103_v32, 0.0 }
  0x2f   :  { %128 = vst [vmem:[#allocation7] sm:$0xff] %v112_v29  ;;  %129 = vst [vmem:[#allocation7 + $0x8] sm:$0xff] %v113_v30  ;;  %v182_v42 = vunpack.c.l.bf16 %v199_v28  ;;  %v183_v43 = vunpack.c.h.bf16 %v199_v28  ;;  %v186_v44 = vunpack.c.l.bf16 %v200_v33  ;;  %v187_v45 = vunpack.c.h.bf16 %v200_v33 }
  0x30   :  { %130 = vst [vmem:[#allocation7 + $0x10] sm:$0xff] %v114_v35  ;;  %131 = vst [vmem:[#allocation7 + $0x18] sm:$0xff] %v115_v36  ;;  %v190_v46 = vunpack.c.l.bf16 %v201_v34  ;;  %v191_v47 = vunpack.c.h.bf16 %v201_v34  ;;  %v194_v50 = vunpack.c.l.bf16 %v202_v39  ;;  %v195_v51 = vunpack.c.h.bf16 %v202_v39 }
  0x31   :  { %132 = vst [vmem:[#allocation7 + $0x20] sm:$0xff] %v116_v37  ;;  %133 = vst [vmem:[#allocation7 + $0x28] sm:$0xff] %v117_v38  ;;  %v83_v48 = vmul.f32 %v182_v42, %v328_v1  ;;  %v84_v49 = vmul.f32 %v183_v43, %v328_v1  ;;  %v85_v52 = vmul.f32 %v186_v44, %v328_v1 }
  0x32   :  { %134 = vst [vmem:[#allocation7 + $0x30] sm:$0xff] %v118_v40  ;;  %135 = vst [vmem:[#allocation7 + $0x38] sm:$0xff] %v119_v41  ;;  %v86_v53 = vmul.f32 %v187_v45, %v328_v1  ;;  %v87_v54 = vmul.f32 %v190_v46, %v328_v1  ;;  %v88_v55 = vmul.f32 %v191_v47, %v328_v1 }
  0x33   :  { %v104_v56 = vadd.f32 %v330_v7, %v83_v48  ;;  %v105_v57 = vadd.f32 %v330_v7, %v84_v49  ;;  %v89_v58 = vmul.f32 %v194_v50, %v328_v1  ;;  %v90_v59 = vmul.f32 %v195_v51, %v328_v1 }
  0x34   :  { %v106_v60 = vadd.f32 %v330_v7, %v85_v52  ;;  %v107_v61 = vadd.f32 %v330_v7, %v86_v53  ;;  %v108_v62 = vadd.f32 %v330_v7, %v87_v54  ;;  %v109_v63 = vadd.f32 %v330_v7, %v88_v55 }
  0x35   :  { %v120_v0 = vmax.f32 %v104_v56, 0.0  ;;  %v121_v2 = vmax.f32 %v105_v57, 0.0  ;;  %v110_v3 = vadd.f32 %v330_v7, %v89_v58  ;;  %v111_v4 = vadd.f32 %v330_v7, %v90_v59 }
  0x36   :  { %v122_v5 = vmax.f32 %v106_v60, 0.0  ;;  %v123_v6 = vmax.f32 %v107_v61, 0.0  ;;  %v124_v8 = vmax.f32 %v108_v62, 0.0  ;;  %v125_v1 = vmax.f32 %v109_v63, 0.0 }
  0x37   :  { %136 = vst [vmem:[#allocation7 + $0x40] sm:$0xff] %v120_v0  ;;  %137 = vst [vmem:[#allocation7 + $0x48] sm:$0xff] %v121_v2  ;;  %v126_v9 = vmax.f32 %v110_v3, 0.0  ;;  %v127_v10 = vmax.f32 %v111_v4, 0.0 }
  0x38   :  { %138 = vst [vmem:[#allocation7 + $0x50] sm:$0xff] %v122_v5  ;;  %139 = vst [vmem:[#allocation7 + $0x58] sm:$0xff] %v123_v6 }
  0x39   :  { %140 = vst [vmem:[#allocation7 + $0x60] sm:$0xff] %v124_v8  ;;  %141 = vst [vmem:[#allocation7 + $0x68] sm:$0xff] %v125_v1 }
  0x3a   :  { %142 = vst [vmem:[#allocation7 + $0x70] sm:$0xff] %v126_v9  ;;  %143 = vst [vmem:[#allocation7 + $0x78] sm:$0xff] %v127_v10 }
  0x3b   :  { %265 = shalt.err (!%p262_p6)
}
  0x3c   :  { %s266_s10 = scalar_lea.hbm %s378_s2, 2048 }
  0x3d   :  { %p267_p7 = scmp.ne.s32.totalorder %s378_s2, %s266_s10  ;;  %p270_p8 = scmp.lt.u32.totalorder %s266_s10, %s378_s2 }
  0x3f   :  { %p272_p9 = pnand %p270_p8, %p267_p7 }
  0x41   :  { %275 = shalt.err (!%p272_p9)
}
  0x42   :  { %s287_s15 = smov 128   ;;  %s288_s16 = smov 8  }
  0x43   :  { %155 = dma.vmem_to_hbm [thread:$0]  %s150_s6, 2048, %s378_s2, [#allocation4], %s287_s15, %s287_s15, %s288_s16  }
  0x44   :  { %280 = dma.done.wait [#allocation4], 2048  }
  0x45   :  { %281 = vsyncadd [#allocation4], 4294965248 }
  0x46   :  { %159 = vsyncpa [#allocation3], 1 }
  0x47   :  { %160 = vsyncpa [#allocation6], 1 }
  0x48   :  { %161 = vsyncpa [#allocation4], 1 }

// kernel: _block_forward.2
= control target key start
LH: loop header
LB: loop body
LE: loop exit
PB: predicated region body
PF: predicated region fallthrough
CT: control target
= control target key end

     0   :  { %9 = vsyncpa [#allocation3], 0  ;;  %s798_s0 = inlined_call_operand.hbm [shape: bf16[1,128,64], index: 0, kind: input, shape index: {}]   ;;  %s799_s1 = inlined_call_operand.hbm [shape: bf16[1,64,128], index: 1, kind: input, shape index: {}]   ;;  %s800_s2 = inlined_call_operand.hbm [shape: bf16[1,128,128], index: 2, kind: output, shape index: {0}]   ;;  %s801_s3 = inlined_call_operand.hbm [shape: f32[1,1,2,128], index: 3, kind: output, shape index: {1}]  }
   0x1   :  { %10 = vsyncpa [#allocation6], 0 }
   0x2   :  { %11 = vsyncpa [#allocation4], 0 }
   0x3   :  { %12 = vsyncpa [#allocation9], 0  ;;  %s683_s12 = smov [#allocation2]   ;;  %s587_s16 = scalar_lea.hbm %s798_s0, 1024 }
   0x4   :  { %s18_s13 = sshll.u32 %s683_s12, 4  ;;  %p588_p0 = scmp.ne.s32.totalorder %s798_s0, %s587_s16  ;;  %s19_s13 = int_to_ptr.vmem [resolvable:$true] %s18_s13 }
   0x5   :  { %p591_p1 = scmp.lt.u32.totalorder %s587_s16, %s798_s0 }
   0x7   :  { %p593_p2 = pnand %p591_p1, %p588_p0 }
   0x9   :  { %596 = shalt.err (!%p593_p2)
}
   0xa   :  { %s597_s21 = scalar_lea.vmem %s19_s13, 1024  ;;  %p602_p4 = scmp.lt.s32.totalorder %s19_s13, %s19_s13 }
   0xb   :  { %p598_p3 = scmp.ne.s32.totalorder %s19_s13, %s597_s21  ;;  %p603_p5 = scmp.lt.s32.totalorder %s597_s21, %s597_s21 }
   0xd   :  { %p604_p6 = por %p603_p5, %p602_p4 }
   0xf   :  { %p605_p7 = pnand %p604_p6, %p598_p3 }
  0x11   :  { %608 = shalt.err (!%p605_p7)
}
  0x12   :  { %s684_s22 = smov 64   ;;  %s685_s23 = smov 4  }
  0x13   :  { %24 = dma.hbm_to_vmem [thread:$0]  %s798_s0, 1024, %s19_s13, [#allocation3], %s684_s22, %s684_s22, %s685_s23  }
  0x14   :  { %s686_s26 = smov [#allocation5]   ;;  %s609_s30 = scalar_lea.hbm %s799_s1, 512 }
  0x15   :  { %s30_s27 = sshll.u32 %s686_s26, 4  ;;  %p610_p8 = scmp.ne.s32.totalorder %s799_s1, %s609_s30  ;;  %s31_s27 = int_to_ptr.vmem [resolvable:$true] %s30_s27 }
  0x16   :  { %p613_p9 = scmp.lt.u32.totalorder %s609_s30, %s799_s1 }
  0x18   :  { %p615_p10 = pnand %p613_p9, %p610_p8 }
  0x1a   :  { %618 = shalt.err (!%p615_p10)
}
  0x1b   :  { %s619_s8 = scalar_lea.vmem %s31_s27, 512  ;;  %p624_p12 = scmp.lt.s32.totalorder %s31_s27, %s31_s27 }
  0x1c   :  { %p620_p11 = scmp.ne.s32.totalorder %s31_s27, %s619_s8  ;;  %p625_p13 = scmp.lt.s32.totalorder %s619_s8, %s619_s8 }
  0x1e   :  { %p626_p0 = por %p625_p13, %p624_p12 }
  0x20   :  { %p627_p1 = pnand %p626_p0, %p620_p11 }
  0x22   :  { %630 = shalt.err (!%p627_p1)
}
  0x23   :  { %36 = dma.hbm_to_vmem [thread:$0]  %s799_s1, 512, %s31_s27, [#allocation6], %s684_s22, %s684_s22, %s685_s23  }
  0x24   :  { %675 = dma.done.wait [#allocation3], 1024  }
  0x25   :  { %676 = vsyncadd [#allocation3], 4294966272 }
  0x26   :  { %677 = dma.done.wait [#allocation6], 512  }
  0x27   :  { %678 = vsyncadd [#allocation6], 4294966784  ;;  %v575_v0 = vld [vmem:[#allocation5] sm:$0xff]   ;;  %v576_v1 = vld [vmem:[#allocation5 + $0x8] sm:$0xff]   ;;  %vm132_vm0 = vcmask 523264   ;;  %s687_s1 = smov [#allocation7]  }
  0x28   :  { %537 = vmatprep.subr.bf16.mxu0 %v575_v0  ;;  %561 = vmatprep.subr.bf16.mxu1 %v575_v0  ;;  %v577_v2 = vld [vmem:[#allocation5 + $0x10] sm:$0xff]   ;;  %v579_v3 = vld [vmem:[#allocation2] sm:$0xff]   ;;  %v578_v4 = vld [vmem:[#allocation5 + $0x18] sm:$0xff]   ;;  %s399_s10 = sshll.u32 %s687_s1, 4  ;;  %s400_s10 = int_to_ptr.vmem [resolvable:$true] %s399_s10 }
  0x29   :  { %538 = vmatpush3.bf16.msra.mxu0 %v575_v0  ;;  %565 = vmatpush3.bf16.msra.mxu1 %v575_v0  ;;  %v583_v5 = vld [vmem:[#allocation2 + $0x20] sm:$0xff]   ;;  %v580_v6 = vld [vmem:[#allocation2 + $0x8] sm:$0xff]   ;;  %v581_v8 = vld [vmem:[#allocation2 + $0x10] sm:$0xff]   ;;  %s631_s11 = scalar_lea.vmem %s400_s10, 1024  ;;  %p636_p3 = scmp.lt.s32.totalorder %s400_s10, %s400_s10 }
  0x2a   :  { %539 = vmatprep.subr.bf16.mxu0 %v576_v1  ;;  %562 = vmatprep.subr.bf16.mxu1 %v576_v1  ;;  %v584_v7 = vld [vmem:[#allocation2 + $0x28] sm:$0xff]   ;;  %v585_v9 = vld [vmem:[#allocation2 + $0x30] sm:$0xff]   ;;  %v582_v10 = vld [vmem:[#allocation2 + $0x18] sm:$0xff]   ;;  %p632_p2 = scmp.ne.s32.totalorder %s400_s10, %s631_s11  ;;  %p637_p4 = scmp.lt.s32.totalorder %s631_s11, %s631_s11 }
  0x2b   :  { %545 = vmatprep.mubr.msk.bf16.mxu0 %vm132_vm0, %v579_v3  ;;  %553 = vmatprep.mubr.msk.bf16.mxu1 %vm132_vm0, %v583_v5  ;;  %v586_v11 = vld [vmem:[#allocation2 + $0x38] sm:$0xff]  }
  0x2c   :  { %p638_p5 = por %p637_p4, %p636_p3 }
  0x2d   :  { %540 = vmatpush3.bf16.msra.mxu0 %v576_v1  ;;  %566 = vmatpush3.bf16.msra.mxu1 %v576_v1 }
  0x2e   :  { %541 = vmatprep.subr.bf16.mxu0 %v577_v2  ;;  %563 = vmatprep.subr.bf16.mxu1 %v577_v2  ;;  %p639_p6 = pnand %p638_p5, %p632_p2 }
  0x31   :  { %542 = vmatpush3.bf16.msra.mxu0 %v577_v2  ;;  %567 = vmatpush3.bf16.msra.mxu1 %v577_v2 }
  0x32   :  { %543 = vmatprep.subr.bf16.mxu0 %v578_v4  ;;  %564 = vmatprep.subr.bf16.mxu1 %v578_v4 }
  0x35   :  { %544 = vmatpush3.bf16.msra.mxu0 %v578_v4  ;;  %568 = vmatpush3.bf16.msra.mxu1 %v578_v4 }
  0x38   :  { %546 = vmatmul.mubr.msk.bf16.vlgmr.msra.gmra.mrb[0].mxu0 %vm132_vm0, %v580_v6  ;;  %554 = vmatmul.mubr.msk.bf16.vlgmr.msra.gmra.mrb[0].mxu1 %vm132_vm0, %v584_v7 }
  0x39   :  { %549 = vmatprep.mubr.msk.bf16.mxu0 %vm132_vm0, %v581_v8  ;;  %557 = vmatprep.mubr.msk.bf16.mxu1 %vm132_vm0, %v585_v9 }
  0x40   :  { %550 = vmatmul.mubr.msk.bf16.gmra.mrb[4].mxu0 %vm132_vm0, %v582_v10  ;;  %558 = vmatmul.mubr.msk.bf16.gmra.mrb[4].mxu1 %vm132_vm0, %v586_v11 }
 0x10b   :  { %v547_v12 = vpop.f32.mrb[0].mxu0  ;;  %v747_v13 = vpop.f32.mrb[0].mxu1 }
 0x10c   :  { %v191_v14 = vpop.f32.mrb[1].mxu0  ;;  %v749_v15 = vpop.f32.mrb[1].mxu1  ;;  %v278_v27 = vmul.f32 %v547_v12, %v547_v12 }
 0x10d   :  { %v548_v16 = vpop.f32.mrb[2].mxu0  ;;  %v751_v17 = vpop.f32.mrb[2].mxu1  ;;  %v276_v22 = vmul.f32 %v191_v14, %v191_v14  ;;  %v284_v57 = vmul.f32 %v749_v15, %v749_v15 }
 0x10e   :  { %v486_v18 = vpack.c.bf16 %v548_v16, %v547_v12  ;;  %v194_v19 = vpop.f32.mrb[3].mxu0  ;;  %v506_v20 = vpack.c.bf16 %v751_v17, %v747_v13  ;;  %v755_v21 = vpop.f32.mrb[3].mxu1  ;;  %v279_v30 = vmul.f32 %v548_v16, %v548_v16 }
 0x10f   :  { %v254_v23 = vadd.f32 %v194_v19, %v191_v14  ;;  %v277_v24 = vmul.f32 %v194_v19, %v194_v19  ;;  %v481_v25 = vpack.c.bf16 %v194_v19, %v191_v14  ;;  %v501_v26 = vpack.c.bf16 %v755_v21, %v749_v15 }
 0x110   :  { %518 = vst [vmem:[#allocation7 + $0x8] sm:$0xff] %v486_v18   ;;  %522 = vst [vmem:[#allocation7 + $0x28] sm:$0xff] %v506_v20  }
 0x111   :  { %v255_v28 = vadd.f32 %v547_v12, %v254_v23  ;;  %v292_v29 = vadd.f32 %v277_v24, %v276_v22  ;;  %482 = vst [vmem:[#allocation7] sm:$0xff] %v481_v25   ;;  %521 = vst [vmem:[#allocation7 + $0x20] sm:$0xff] %v501_v26  }
 0x113   :  { %v293_v31 = vadd.f32 %v292_v29, %v278_v27  ;;  %v551_v32 = vpop.f32.mrb[4].mxu0  ;;  %v256_v33 = vadd.f32 %v548_v16, %v255_v28  ;;  %v559_v34 = vpop.f32.mrb[4].mxu1 }
 0x114   :  { %v207_v35 = vpop.f32.mrb[5].mxu0  ;;  %v239_v36 = vpop.f32.mrb[5].mxu1  ;;  %v282_v51 = vmul.f32 %v551_v32, %v551_v32 }
 0x115   :  { %v257_v37 = vadd.f32 %v256_v33, %v207_v35  ;;  %v280_v38 = vmul.f32 %v207_v35, %v207_v35  ;;  %v294_v39 = vadd.f32 %v293_v31, %v279_v30  ;;  %v552_v40 = vpop.f32.mrb[6].mxu0  ;;  %v560_v41 = vpop.f32.mrb[6].mxu1 }
 0x116   :  { %v496_v42 = vpack.c.bf16 %v552_v40, %v551_v32  ;;  %v210_v43 = vpop.f32.mrb[7].mxu0  ;;  %v516_v44 = vpack.c.bf16 %v560_v41, %v559_v34  ;;  %v242_v45 = vpop.f32.mrb[7].mxu1  ;;  %v283_v54 = vmul.f32 %v552_v40, %v552_v40 }
 0x117   :  { %v295_v46 = vadd.f32 %v294_v39, %v280_v38  ;;  %v258_v47 = vadd.f32 %v257_v37, %v210_v43  ;;  %v281_v48 = vmul.f32 %v210_v43, %v210_v43  ;;  %v491_v49 = vpack.c.bf16 %v210_v43, %v207_v35 }
 0x118   :  { %520 = vst [vmem:[#allocation7 + $0x18] sm:$0xff] %v496_v42   ;;  %524 = vst [vmem:[#allocation7 + $0x38] sm:$0xff] %v516_v44   ;;  %v511_v50 = vpack.c.bf16 %v242_v45, %v239_v36 }
 0x119   :  { %v259_v52 = vadd.f32 %v551_v32, %v258_v47  ;;  %v296_v53 = vadd.f32 %v295_v46, %v281_v48  ;;  %519 = vst [vmem:[#allocation7 + $0x10] sm:$0xff] %v491_v49  }
 0x11a   :  { %523 = vst [vmem:[#allocation7 + $0x30] sm:$0xff] %v511_v50  }
 0x11b   :  { %v297_v55 = vadd.f32 %v296_v53, %v282_v51  ;;  %v260_v56 = vadd.f32 %v552_v40, %v259_v52 }
 0x11c   :  { %642 = shalt.err (!%p639_p6)
}
 0x11d   :  { %s643_s14 = scalar_lea.hbm %s800_s2, 1024 }
 0x11e   :  { %p644_p7 = scmp.ne.s32.totalorder %s800_s2, %s643_s14  ;;  %p647_p8 = scmp.lt.u32.totalorder %s643_s14, %s800_s2 }
 0x120   :  { %p649_p9 = pnand %p647_p8, %p644_p7 }
 0x122   :  { %652 = shalt.err (!%p649_p9)
}
 0x123   :  { %405 = dma.vmem_to_hbm [thread:$0]  %s400_s10, 1024, %s800_s2, [#allocation4], %s684_s22, %s684_s22, %s685_s23   ;;  %v261_v58 = vadd.f32 %v260_v56, %v749_v15  ;;  %v298_v59 = vadd.f32 %v297_v55, %v283_v54  ;;  %v285_v62 = vmul.f32 %v755_v21, %v755_v21  ;;  %v286_v63 = vmul.f32 %v747_v13, %v747_v13 }
 0x124   :  { %v287_v2 = vmul.f32 %v751_v17, %v751_v17  ;;  %v288_v5 = vmul.f32 %v239_v36, %v239_v36  ;;  %v289_v10 = vmul.f32 %v242_v45, %v242_v45  ;;  %v290_v11 = vmul.f32 %v559_v34, %v559_v34  ;;  %s688_s2 = smov [#allocation8]  }
 0x125   :  { %v299_v60 = vadd.f32 %v298_v59, %v284_v57  ;;  %v262_v61 = vadd.f32 %v261_v58, %v755_v21  ;;  %v291_v15 = vmul.f32 %v560_v41, %v560_v41  ;;  %s412_s21 = sshll.u32 %s688_s2, 4  ;;  %s413_s21 = int_to_ptr.vmem [resolvable:$true] %s412_s21 }
 0x126   :  { %s653_s22 = scalar_lea.vmem %s413_s21, 32  ;;  %p658_p11 = scmp.lt.s32.totalorder %s413_s21, %s413_s21 }
 0x127   :  { %v263_v0 = vadd.f32 %v747_v13, %v262_v61  ;;  %v300_v1 = vadd.f32 %v299_v60, %v285_v62  ;;  %p654_p10 = scmp.ne.s32.totalorder %s413_s21, %s653_s22  ;;  %p659_p12 = scmp.lt.s32.totalorder %s653_s22, %s653_s22 }
 0x129   :  { %v301_v3 = vadd.f32 %v300_v1, %v286_v63  ;;  %v264_v4 = vadd.f32 %v751_v17, %v263_v0  ;;  %p660_p13 = por %p659_p12, %p658_p11 }
 0x12b   :  { %v265_v6 = vadd.f32 %v264_v4, %v239_v36  ;;  %v302_v7 = vadd.f32 %v301_v3, %v287_v2  ;;  %p661_p0 = pnand %p660_p13, %p654_p10 }
 0x12d   :  { %v303_v8 = vadd.f32 %v302_v7, %v288_v5  ;;  %v266_v9 = vadd.f32 %v265_v6, %v242_v45 }
 0x12f   :  { %v267_v12 = vadd.f32 %v559_v34, %v266_v9  ;;  %v304_v14 = vadd.f32 %v303_v8, %v289_v10 }
 0x131   :  { %v268_v16 = vadd.f32 %v560_v41, %v267_v12  ;;  %v305_v18 = vadd.f32 %v304_v14, %v290_v11 }
 0x133   :  { %v269_v13 = vrot.slane %v268_v16, 4  ;;  %v306_v19 = vadd.f32 %v305_v18, %v291_v15 }
 0x135   :  { %v270_v20 = vadd.f32 %v269_v13, %v268_v16  ;;  %v307_v21 = vrot.slane %v306_v19, 4 }
 0x137   :  { %v271_v22 = vrot.slane %v270_v20, 2  ;;  %v308_v23 = vadd.f32 %v307_v21, %v306_v19 }
 0x139   :  { %v272_v24 = vadd.f32 %v271_v22, %v270_v20  ;;  %v309_v17 = vrot.slane %v308_v23, 2 }
 0x13b   :  { %v273_v25 = vrot.slane %v272_v24, 1  ;;  %v310_v26 = vadd.f32 %v309_v17, %v308_v23 }
 0x13d   :  { %v274_v27 = vadd.f32 %v273_v25, %v272_v24  ;;  %v311_v28 = vrot.slane %v310_v26, 1 }
 0x13f   :  { %275 = vst [vmem:[#allocation8] sm:$0x1] %v274_v27  ;;  %v312_v29 = vadd.f32 %v311_v28, %v310_v26 }
 0x141   :  { %313 = vst [vmem:[#allocation8 + $0x1] sm:$0x1] %v312_v29 }
 0x142   :  { %664 = shalt.err (!%p661_p0)
}
 0x143   :  { %s665_s25 = scalar_lea.hbm %s801_s3, 32 }
 0x144   :  { %p666_p1 = scmp.ne.s32.totalorder %s801_s3, %s665_s25  ;;  %p669_p2 = scmp.lt.u32.totalorder %s665_s25, %s801_s3 }
 0x146   :  { %p671_p3 = pnand %p669_p2, %p666_p1 }
 0x148   :  { %674 = shalt.err (!%p671_p3)
}
 0x149   :  { %415 = dma.vmem_to_hbm [thread:$0]  %s413_s21, 32, %s801_s3, [#allocation9]  }
 0x14a   :  { %679 = dma.done.wait [#allocation4], 1024  }
 0x14b   :  { %680 = vsyncadd [#allocation4], 4294966272 }
 0x14c   :  { %681 = dma.done.wait [#allocation9], 32  }
 0x14d   :  { %682 = vsyncadd [#allocation9], 4294967264 }
 0x14e   :  { %422 = vsyncpa [#allocation3], 1 }
 0x14f   :  { %423 = vsyncpa [#allocation6], 1 }
 0x150   :  { %424 = vsyncpa [#allocation4], 1 }
 0x151   :  { %425 = vsyncpa [#allocation9], 1 }

</bundles_post_ra>
